<compile_context>
chip_gen: v5e
topology: v5e:2x2
jax: 0.10.0
libtpu: 0.0.40
codegen_flags: <defaults>
</compile_context>

<pallas_src>
import math

import numpy as np
import jax
import jax.numpy as jnp
from jax.experimental import pallas as pl
from jax.experimental.pallas import tpu as pltpu

_LANE = 128
_SUBLANE = 8


def _round_up(x, m):
    return ((x + m - 1) // m) * m


def _sublane_multiple(dtype):
    # f32 -> 8 rows, bf16 -> 16 rows (packed along sublanes).
    itemsize = jnp.dtype(dtype).itemsize
    return _SUBLANE * max(1, 4 // itemsize)


def _tpu_vmem_bytes():
    try:
        info = pltpu.get_tpu_info()
        v = getattr(info, "vmem_capacity_bytes", None)
        if isinstance(v, int) and v > 0:
            return v
    except Exception:
        pass
    return 64 << 20  # conservative default (v7x per-core VMEM)


def _num_tensorcores():
    try:
        info = pltpu.get_tpu_info()
        for attr in ("num_tensorcores", "tensorcores_per_chip",
                     "tensor_core_count", "num_cores"):
            v = getattr(info, attr, None)
            if isinstance(v, int) and 0 < v <= 8:
                return v
    except Exception:
        pass
    try:
        kind = jax.devices()[0].device_kind.lower()
        if "v7" in kind:
            return 2
    except Exception:
        pass
    return 1


def _matmul_kernel(z_ref, w_ref, o_ref):
    # z_ref: (tr, K) per-sample-weight tile; w_ref: (K, N) resident table;
    # o_ref: (tr, N) lane-dense output tile.  f32 MXU accumulation always.
    o_ref[...] = jnp.dot(
        z_ref[...], w_ref[...], preferred_element_type=jnp.float32
    ).astype(o_ref.dtype)


def _tiled_matmul(x, w, tr, out_dtype, vmem_limit_bytes):
    """x:(M,K) @ w:(K,N)  with M % tr == 0, tr a sublane multiple."""
    M, K = x.shape
    N = w.shape[1]
    cost = pl.CostEstimate(
        flops=2 * M * K * N,
        transcendentals=0,
        bytes_accessed=(M * K * x.dtype.itemsize
                        + K * N * w.dtype.itemsize
                        + M * N * jnp.dtype(out_dtype).itemsize),
    )
    return pl.pallas_call(
        _matmul_kernel,
        out_shape=jax.ShapeDtypeStruct((M, N), out_dtype),
        grid_spec=pltpu.PrefetchScalarGridSpec(
            num_scalar_prefetch=0,
            grid=(M // tr,),
            in_specs=[
                pl.BlockSpec((tr, K), lambda i: (i, 0)),
                # Constant block index: the table stays resident in VMEM and
                # its DMA is elided after the first step.
                pl.BlockSpec((K, N), lambda i: (0, 0)),
            ],
            out_specs=pl.BlockSpec((tr, N), lambda i: (i, 0)),
        ),
        compiler_params=pltpu.CompilerParams(
            dimension_semantics=("parallel",),
            vmem_limit_bytes=vmem_limit_bytes,
            # Allow XLA to fuse the wrapper-side row pad of Z into the operand.
            allow_input_fusion=[True, False],
        ),
        cost_estimate=cost,
    )(x, w)


def atom_embedding_bag(Z, W, *, tile_atoms=None, stream_dtype=None,
                       out_dtype=None, min_pallas_out_elems=1 << 15):
    """h[i,:] = sum_j Z[i,j] * W[j,:]  (EmbeddingBag(mode='sum'), weights = Z).

    stream_dtype: optional narrower dtype (e.g. jnp.bfloat16) for streaming
        Z / W through the kernel; f32 MXU accumulation is kept.  Opt-in only,
        since it changes output precision.
    out_dtype: dtype of the returned embeddings (default: Z.dtype).
    """
    n_atoms, n_cols = Z.shape
    n_rows, emb = W.shape
    if n_cols > n_rows:
        raise ValueError("Z.shape[1] must be <= num_elements + 1")
    if out_dtype is None:
        out_dtype = Z.dtype
    out_dtype = jnp.dtype(out_dtype)

    # Only rows 0..n_cols-1 of the table are ever gathered: slice W (a one-off
    # O(n_cols*emb) copy that is DMA'd into VMEM once anyway) instead of
    # widening Z, which would permanently inflate the per-atom read stream.
    compute_dtype = jnp.dtype(stream_dtype) if stream_dtype is not None else jnp.dtype(Z.dtype)
    Zc = Z.astype(compute_dtype)
    Wc = W[:n_cols].astype(compute_dtype)
    K = n_cols
    itemsize = compute_dtype.itemsize
    out_itemsize = out_dtype.itemsize

    # Tiny problems: fixed grid/DMA/launch overhead dwarfs the matmul.
    if n_atoms * emb < min_pallas_out_elems:
        return jnp.dot(Zc, Wc, preferred_element_type=jnp.float32).astype(out_dtype)

    # ---- generation-aware VMEM budget -----------------------------------------
    phys_vmem = _tpu_vmem_bytes()
    if phys_vmem >= (100 << 20):          # v5e / v6e: 128 MiB physical VMEM
        budget, vmem_limit, wk_cap = 26 << 20, 32 << 20, 8 << 20
    else:                                 # v7x: 64 MiB per TensorCore
        budget, vmem_limit, wk_cap = 22 << 20, 28 << 20, 6 << 20

    # ---- lane-dense layout ------------------------------------------------------
    # The output is the dominant HBM stream; a last dim that is not a multiple
    # of 128 forces masked partial stores.  If emb is not lane-aligned, pack p
    # consecutive atoms into one 128-lane-aligned slab row by contracting
    # against a block-diagonal copy of W.  p is additionally scaled up until
    # the Z slab rows are lane-dense too (p*K >= 128).  The Z / h reshapes
    # involved are free (row-major).
    if emb % _LANE == 0:
        p = 1
        Wk = Wc
    else:
        base_p = _LANE // math.gcd(emb, _LANE)
        p = base_p * max(1, -(-_LANE // (base_p * K)))        # lane-dense Z rows
        if (p * K) * (p * emb) * itemsize > wk_cap:
            p = base_p                                        # minimal packing
        if (p * K) * (p * emb) * itemsize <= wk_cap:
            eye = jnp.eye(p, dtype=compute_dtype)
            Wk = jnp.einsum("pq,ke->pkqe", eye, Wc).reshape(p * K, p * emb)
        else:
            # Pathological emb: pad the lane dim instead (extra output bytes
            # and a post-slice copy; only when the packed table is too large).
            p = 1
            Wk = jnp.pad(Wc, ((0, 0), (0, _round_up(emb, _LANE) - emb)))
    Kc, N = Wk.shape

    # ---- tile selection ---------------------------------------------------------
    sub = max(_sublane_multiple(compute_dtype), _sublane_multiple(out_dtype))
    quantum = sub * p                                   # atom-tile multiple
    w_foot = 2 * Kc * N * itemsize                      # double-buffered table
    per_atom = K * itemsize + emb * out_itemsize        # streamed bytes / atom

    if tile_atoms is None:
        tile = None
        for mult in (512, 256, 128, 64, 32, 16, 8, 4, 2, 1):
            cand = mult * quantum
            if w_foot + 2 * cand * per_atom <= budget:
                tile = cand
                break
        if tile is None:
            # Even the minimal tile does not fit the VMEM budget -> plain XLA.
            return jnp.dot(Zc, Wc, preferred_element_type=jnp.float32).astype(out_dtype)
        # Don't overshoot the real atom count (small-M / large-emb shapes).
        tile = min(tile, _round_up(n_atoms, quantum))
        # Keep >= 2 pipelined grid steps per TensorCore when the problem allows
        # (v7x shards the "parallel" axis across its 2 cores).
        min_steps = 2 * _num_tensorcores()
        while tile >= 2 * quantum and pl.cdiv(n_atoms, tile) < min_steps:
            tile //= 2
    else:
        tile = tile_atoms
    tile = _round_up(max(tile, quantum), quantum)

    # Single wrapper-side pad: ragged atom count -> whole number of tiles.
    n_pad = _round_up(n_atoms, tile)
    if n_pad != n_atoms:
        Zc = jnp.pad(Zc, ((0, n_pad - n_atoms), (0, 0)))

    x = Zc.reshape(n_pad // p, p * K) if p > 1 else Zc   # free row-major reshape

    h = _tiled_matmul(x, Wk, tile // p, out_dtype, vmem_limit)

    if p > 1:
        h = h.reshape(n_pad, emb)                         # free row-major reshape
    elif N != emb:
        h = h[:, :emb]
    return h[:n_atoms] if n_pad != n_atoms else h


if __name__ == "__main__":
    key = jax.random.PRNGKey(0)
    k1, k2, k3, k4, k5, k6 = jax.random.split(key, 6)

    def init_table(k, num_elements, emb_size):
        # torch.nn.init.uniform_(weight, -sqrt(3), sqrt(3))
        return jax.random.uniform(
            k, (num_elements + 1, emb_size), dtype=jnp.float32,
            minval=-np.sqrt(3), maxval=np.sqrt(3),
        )

    # --- case 1: emb_size=32 (not lane-aligned -> packed slab path), ragged N ---
    emb1, nelem1, natoms1 = 32, 7, 2000
    W1 = init_table(k1, nelem1, emb1)
    Z1 = jax.random.uniform(k2, (natoms1, nelem1 + 1), dtype=jnp.float32)
    h1 = jax.block_until_ready(atom_embedding_bag(Z1, W1))
    ref1 = Z1 @ W1[: Z1.shape[1], :]
    np.testing.assert_allclose(np.asarray(h1), np.asarray(ref1), rtol=1e-4, atol=1e-4)

    # --- case 2: emb_size=256 (lane-aligned direct path), Z cols < table rows ---
    emb2, nelem2, natoms2, ncols2 = 256, 118, 531, 100
    W2 = init_table(k3, nelem2, emb2)
    Z2 = jax.random.uniform(k4, (natoms2, ncols2), dtype=jnp.float32)
    h2 = jax.block_until_ready(atom_embedding_bag(Z2, W2))
    ref2 = Z2 @ W2[:ncols2, :]
    np.testing.assert_allclose(np.asarray(h2), np.asarray(ref2), rtol=1e-4, atol=1e-4)

    # --- case 3: tiny problem -> plain-XLA fallback path ---
    emb3, nelem3, natoms3 = 32, 7, 16
    W3 = init_table(k5, nelem3, emb3)
    Z3 = jax.random.uniform(k6, (natoms3, nelem3 + 1), dtype=jnp.float32)
    h3 = jax.block_until_ready(atom_embedding_bag(Z3, W3))
    ref3 = Z3 @ W3[: Z3.shape[1], :]
    np.testing.assert_allclose(np.asarray(h3), np.asarray(ref3), rtol=1e-4, atol=1e-4)

    # --- case 4: opt-in bf16 streaming (f32 MXU accumulation kept) ---
    h4 = jax.block_until_ready(
        atom_embedding_bag(Z2, W2, stream_dtype=jnp.bfloat16))
    z_b = np.asarray(jnp.asarray(Z2.astype(jnp.bfloat16), jnp.float32))
    w_b = np.asarray(jnp.asarray(W2[:ncols2].astype(jnp.bfloat16), jnp.float32))
    ref4 = z_b @ w_b
    np.testing.assert_allclose(np.asarray(h4), ref4, rtol=5e-3, atol=5e-3)

    print("KERNEL_OK")
</pallas_src>

<mosaic_0001>
module attributes {stable_mosaic.version = 11 : i64} {
  func.func @_matmul_kernel(%arg0: i32, %arg1: memref<64x128xf32, #tpu.memory_space<vmem>>, %arg2: memref<128x512xf32, #tpu.memory_space<vmem>>, %arg3: memref<64x512xf32, #tpu.memory_space<vmem>>) attributes {dimension_semantics = [#tpu.dimension_semantics<parallel>], iteration_bounds = array<i64: 2>, scalar_prefetch = 0 : i64, scratch_operands = 0 : i64, tpu.core_type = #tpu.core_type<tc>, window_params = [{transform_indices = @transform_0, window_bounds = array<i64: 64, 128>}, {pipeline_mode = #tpu.pipeline_mode<synchronous>, transform_indices = @transform_1, window_bounds = array<i64: 128, 512>}, {transform_indices = @transform_2, window_bounds = array<i64: 64, 512>}]} {
    %c0 = arith.constant 0 : index
    %c0_0 = arith.constant 0 : index
    %0 = vector.load %arg1[%c0, %c0_0] : memref<64x128xf32, #tpu.memory_space<vmem>>, vector<64x128xf32>
    %c0_1 = arith.constant 0 : index
    %c0_2 = arith.constant 0 : index
    %1 = vector.load %arg2[%c0_1, %c0_2] : memref<128x512xf32, #tpu.memory_space<vmem>>, vector<128x512xf32>
    %cst = arith.constant dense<0.000000e+00> : vector<64x512xf32>
    %2 = tpu.matmul %0, %1, %cst {dimension_numbers = #tpu.dot_dimension_numbers<[1], [0], [0], [1], [0, 0, 1, 1], [], []>} : vector<64x128xf32>, vector<128x512xf32>, vector<64x512xf32> -> vector<64x512xf32>
    %c0_3 = arith.constant 0 : index
    %c0_4 = arith.constant 0 : index
    %3 = vector.load %arg3[%c0_3, %c0_4] : memref<64x512xf32, #tpu.memory_space<vmem>>, vector<64x512xf32>
    tpu.vector_store %arg3[%c0_3, %c0_4], %2 {strides = array<i32>} : memref<64x512xf32, #tpu.memory_space<vmem>>, vector<64x512xf32>,
    return
  }
  func.func @transform_0(%arg0: i32) -> (i32, i32) {
    %c0_i32 = arith.constant 0 : i32
    %c0_i32_0 = arith.constant 0 : i32
    return %arg0, %c0_i32 : i32, i32
  }
  func.func @transform_1(%arg0: i32) -> (i32, i32) {
    %c0_i32 = arith.constant 0 : i32
    %c0_i32_0 = arith.constant 0 : i32
    %c0_i32_1 = arith.constant 0 : i32
    return %c0_i32, %c0_i32_0 : i32, i32
  }
  func.func @transform_2(%arg0: i32) -> (i32, i32) {
    %c0_i32 = arith.constant 0 : i32
    %c0_i32_0 = arith.constant 0 : i32
    return %arg0, %c0_i32 : i32, i32
  }
}

</mosaic_0001>

<bundles_post_ra>
// kernel: tpu_custom_call.1
= control target key start
LH: loop header
LB: loop body
LE: loop exit
PB: predicated region body
PF: predicated region fallthrough
CT: control target
= control target key end

     0   :  { %7 = vsyncpa [#allocation3], 0  ;;  %s974_s0 = inlined_call_operand.hbm [shape: f32[128,128], index: 0, kind: input, shape index: {}]   ;;  %s975_s1 = inlined_call_operand.hbm [shape: f32[128,512], index: 1, kind: input, shape index: {}]   ;;  %s976_s2 = inlined_call_operand.hbm [shape: f32[128,512], index: 2, kind: output, shape index: {}]  }
   0x1   :  { %9 = vsyncpa [#allocation3 + $0x1], 0 }
   0x2   :  { %10 = vsyncpa [#allocation6], 0 }
   0x3   :  { %11 = vsyncpa [#allocation4], 0 }
   0x4   :  { %13 = vsyncpa [#allocation4 + $0x1], 0  ;;  %s788_s9 = smov 0   ;;  %s790_s10 = smov 0  }
   0x5   :  { %s792_s11 = smov 0   ;;  %s794_s12 = smov 0  }
   0x6 LB: > { %s809_s13 = sadd.s32 4294967295, %s764_s12   ;;  %s551_s14 = sadd.s32 4294967294, %s764_s12   ;;  %s764_s12 = sphi %s794_s12, %s986_s12   ;;  %s760_s11 = sphi %s792_s11, %s985_s11   ;;  %s756_s10 = sphi %s790_s10, %s984_s10   ;;  %s752_s9 = sphi %s788_s9, %s983_s9  }
   0x7   : > { %p39_p0 = scmp.ne.s32.totalorder %s756_s10, %s752_s9  ;;  %p40_p1 = scmp.eq.s32.totalorder %s809_s13, 0 }
   0x8   : > { %p84_p2 = scmp.eq.s32.totalorder %s809_s13, 1  ;;  %p90_p3 = scmp.eq.s32.totalorder %s551_s14, 1 }
   0x9   : > { %p818_p4 = por %p40_p1, %p39_p0  ;;  %p552_p5 = scmp.ge.s32.totalorder %s764_s12, 1 }
   0xa   : > { %p823_p6 = por %p90_p3, %p39_p0  ;;  %p97_p7 = scmp.lt.s32.totalorder %s764_s12, 3 }
   0xb   : > { %s108_s19 = sshll.u32 %s975_s1, 4  ;;  %s766_s21 = smov [#allocation5]   ;;  %s109_s19 = int_to_ptr.hbm [resolvable:$true] %s108_s19 }
   0xc   : > { %p831_p8 = pnand %p552_p5, %p97_p7  ;;  %s110_s22 = sshll.u32 %s766_s21, 4  ;;  %s111_s22 = int_to_ptr.vmem [resolvable:$true] %s110_s22 }
   0xd   : > { %s841_s23 = sadd.s32 1, %s764_s12   ;;  %s767_s24 = smov 512  }
   0xe   : > { %p579_p9 = pneg %p831_p8  ;;  %s768_s25 = smov 32  }
   0xf   : > { %s23_s26 = ssub.s32 %s764_s12, %s841_s23  ;;  %s26_s27 = sadd.s32 1, %s760_s11 }
  0x10   : > { %p580_p10 = pnand %p579_p9, %p40_p1  ;;  %p24_p12 = scmp.eq.s32.totalorder %s23_s26, 0 }
  0x11   : > { %p33_p13 = scmp.ne.s32.totalorder %s760_s11, %s756_s10  ;;  %p34_p0 = scmp.eq.s32.totalorder %s764_s12, 0 }
  0x12   : > { %582 = dma.hbm_to_vmem [thread:$0]  (!%p580_p10), %s109_s19, 8192, %s111_s22, [#allocation6], %s767_s24, %s767_s24, %s768_s25  }
  0x13   : > { %p592_p3 = scmp.lt.s32.totalorder %s764_s12, 2  ;;  %p35_p5 = por %p34_p0, %p33_p13 }
  0x14   : > { %s851_s28 = scalar_select %p24_p12, %s760_s11, %s26_s27  }
  0x15   : > { %p855_p7 = por %p84_p2, %p33_p13  ;;  %s124_s30 = sand.u32 1, %s760_s11  }
  0x16   : > { %s568_s3 = sshll.u32 %s764_s12, 6  ;;  %s555_s4 = sshll.u32 %s124_s30, 6 }
  0x17   : > { %s133_s7 = scalar_lea.hbm %s974_s0, %s568_s3  ;;  %s128_s14 = scalar_lea.vmem [#allocation2], %s555_s4 }
  0x18   : > { %s134_s8 = sshll.u32 %s133_s7, 4  ;;  %s136_s17 = sshll.u32 %s128_s14, 4  ;;  %s135_s8 = int_to_ptr.hbm [resolvable:$true] %s134_s8  ;;  %s137_s17 = int_to_ptr.vmem [resolvable:$true] %s136_s17 }
  0x19   : > { %p866_p9 = pnand %p592_p3, %p35_p5  ;;  %s125_s19 = scalar_lea.sflag [#allocation3], %s124_s30 }
  0x1a   : > { %s664_s21 = sshra.s32 %s135_s8, 4  ;;  %s671_s26 = scalar_lea.hbm %s974_s0, 128  ;;  %s665_s21 = int_to_ptr.hbm [resolvable:$true] %s664_s21 }
  0x1b   : > { %s666_s22 = scalar_lea.hbm %s665_s21, 64  ;;  %p668_p10 = pneg %p866_p9 }
  0x1c   : > { %p667_p2 = scmp.ne.s32.totalorder %s665_s21, %s666_s22  ;;  %p672_p0 = scmp.lt.s32.totalorder %s665_s21, %s974_s0 }
  0x1d   : > { %p673_p3 = scmp.lt.s32.totalorder %s671_s26, %s666_s22 }
  0x1e   : > { %p669_p12 = pnand %p668_p10, %p667_p2 }
  0x1f   : > { %p674_p5 = por %p673_p3, %p672_p0 }
  0x20   : > { %p670_p13 = pneg %p669_p12 }
  0x22   : > { %p675_p11 = pnand %p674_p5, %p670_p13 }
  0x24   : > { %678 = shalt.err (!%p675_p11)
}
  0x25   : > { %s769_s30 = smov 128   ;;  %s770_s4 = smov 8  }
  0x26   : > { %586 = dma.hbm_to_vmem [thread:$0]  (!%p866_p9), %s135_s8, 1024, %s137_s17, %s125_s19, %s769_s30, %s769_s30, %s770_s4  }
  0x27   : > { %148 = sbr.rel (%p831_p8) target bundleno = 272 (0x110), region = 28  ;;  %s883_s5 = sand.u32 (!%p831_p8), 1, %s756_s10  }
  0x28   : > { %s559_s6 = sshll.u32 (!%p831_p8), %s883_s5, 6  ;;  %s151_s7 = scalar_lea.sflag (!%p831_p8), [#allocation3], %s883_s5 }
  0x29   : > { %s887_s14 = scalar_lea.vmem (!%p831_p8), [#allocation2], %s559_s6 }
  0x2c   : > { %739 = dma.done.wait (%p818_p4), %s151_s7, 1024  }
  0x2d   : > { %741 = vsyncadd (%p818_p4), %s151_s7, 4294966272 }
  0x2e   : > { %743 = dma.done.wait (%p40_p1), [#allocation6], 8192  }
  0x2f   : > { %745 = vsyncadd (%p40_p1), [#allocation6], 4294959104  ;;  %v253_v0 = vld [vmem:[#allocation5 + $0x1f0] sm:$0xff]  ;;  %v254_v1 = vld [vmem:[#allocation5 + $0x1f8] sm:$0xff]  ;;  %s561_s15 = sshll.u32 %s883_s5, 8  ;;  %s570_s8 = sshll.u32 %s809_s13, 8 }
  0x30   : > { %v249_v2 = vld [vmem:[#allocation5 + $0x1d0] sm:$0xff]  ;;  %337 = vmatpush.msra.mxu2 %v253_v0  ;;  %378 = vmatpush.msra.mxu3 %v254_v1  ;;  %v250_v3 = vld [vmem:[#allocation5 + $0x1d8] sm:$0xff]  ;;  %v251_v6 = vld [vmem:[#allocation5 + $0x1e0] sm:$0xff]  ;;  %s906_s20 = scalar_lea.vmem [#allocation7], %s561_s15  ;;  %s464_s19 = scalar_lea.hbm %s976_s2, %s570_s8 }
  0x31   : > { %v245_v4 = vld [vmem:[#allocation5 + $0x1b0] sm:$0xff]  ;;  %v246_v5 = vld [vmem:[#allocation5 + $0x1b8] sm:$0xff]  ;;  %v252_v7 = vld [vmem:[#allocation5 + $0x1e8] sm:$0xff]  ;;  %255 = vmatpush.msra.mxu0 %v251_v6  ;;  %s465_s21 = sshll.u32 %s906_s20, 4  ;;  %s467_s22 = sshll.u32 %s464_s19, 4  ;;  %s466_s21 = int_to_ptr.vmem [resolvable:$true] %s465_s21  ;;  %s468_s22 = int_to_ptr.hbm [resolvable:$true] %s467_s22 }
  0x32   : > { %338 = vmatpush.msra.mxu2 %v249_v2  ;;  %379 = vmatpush.msra.mxu3 %v250_v3  ;;  %v247_v8 = vld [vmem:[#allocation5 + $0x1c0] sm:$0xff]  ;;  %v248_v9 = vld [vmem:[#allocation5 + $0x1c8] sm:$0xff]  ;;  %v241_v10 = vld [vmem:[#allocation5 + $0x190] sm:$0xff]  ;;  %s452_s13 = scalar_lea.sflag [#allocation4], %s883_s5  ;;  %s708_s24 = sshra.s32 %s468_s22, 4  ;;  %s709_s24 = int_to_ptr.hbm [resolvable:$true] %s708_s24 }
  0x33   : > { %296 = vmatpush.msra.mxu1 %v252_v7  ;;  %v242_v11 = vld [vmem:[#allocation5 + $0x198] sm:$0xff]  ;;  %v243_v12 = vld [vmem:[#allocation5 + $0x1a0] sm:$0xff]  ;;  %v244_v13 = vld [vmem:[#allocation5 + $0x1a8] sm:$0xff]  ;;  %256 = vmatpush.msra.mxu0 %v247_v8  ;;  %s710_s25 = scalar_lea.hbm %s709_s24, 256  ;;  %s714_s3 = scalar_lea.hbm %s976_s2, 512 }
  0x34   : > { %339 = vmatpush.msra.mxu2 %v245_v4  ;;  %380 = vmatpush.msra.mxu3 %v246_v5  ;;  %v237_v14 = vld [vmem:[#allocation5 + $0x170] sm:$0xff]  ;;  %v238_v15 = vld [vmem:[#allocation5 + $0x178] sm:$0xff]  ;;  %v239_v16 = vld [vmem:[#allocation5 + $0x180] sm:$0xff]  ;;  %p711_p1 = scmp.ne.s32.totalorder %s709_s24, %s710_s25  ;;  %p715_p11 = scmp.lt.s32.totalorder %s709_s24, %s976_s2 }
  0x35   : > { %297 = vmatpush.msra.mxu1 %v248_v9  ;;  %v240_v17 = vld [vmem:[#allocation5 + $0x188] sm:$0xff]  ;;  %257 = vmatpush.msra.mxu0 %v243_v12  ;;  %v233_v18 = vld [vmem:[#allocation5 + $0x150] sm:$0xff]  ;;  %v234_v19 = vld [vmem:[#allocation5 + $0x158] sm:$0xff]  ;;  %p716_p9 = scmp.lt.s32.totalorder %s714_s3, %s710_s25 }
  0x36   : > { %340 = vmatpush.msra.mxu2 %v241_v10  ;;  %381 = vmatpush.msra.mxu3 %v242_v11  ;;  %v235_v20 = vld [vmem:[#allocation5 + $0x160] sm:$0xff]  ;;  %v236_v21 = vld [vmem:[#allocation5 + $0x168] sm:$0xff]  ;;  %v229_v22 = vld [vmem:[#allocation5 + $0x130] sm:$0xff]  ;;  %p712_p4 = pnand %p711_p1, %p855_p7 }
  0x37   : > { %298 = vmatpush.msra.mxu1 %v244_v13  ;;  %258 = vmatpush.msra.mxu0 %v239_v16  ;;  %v230_v23 = vld [vmem:[#allocation5 + $0x138] sm:$0xff]  ;;  %v231_v24 = vld [vmem:[#allocation5 + $0x140] sm:$0xff]  ;;  %v232_v25 = vld [vmem:[#allocation5 + $0x148] sm:$0xff]  ;;  %p717_p2 = por %p716_p9, %p715_p11 }
  0x38   : > { %341 = vmatpush.msra.mxu2 %v237_v14  ;;  %382 = vmatpush.msra.mxu3 %v238_v15  ;;  %v225_v26 = vld [vmem:[#allocation5 + $0x110] sm:$0xff]  ;;  %v226_v27 = vld [vmem:[#allocation5 + $0x118] sm:$0xff]  ;;  %v227_v28 = vld [vmem:[#allocation5 + $0x120] sm:$0xff]  ;;  %p713_p8 = pneg %p712_p4 }
  0x39   : > { %299 = vmatpush.msra.mxu1 %v240_v17  ;;  %259 = vmatpush.msra.mxu0 %v235_v20  ;;  %v228_v29 = vld [vmem:[#allocation5 + $0x128] sm:$0xff]  ;;  %v221_v30 = vld [vmem:[#allocation5 + $0xf0] sm:$0xff]  ;;  %v222_v31 = vld [vmem:[#allocation5 + $0xf8] sm:$0xff] }
  0x3a   : > { %342 = vmatpush.msra.mxu2 %v233_v18  ;;  %383 = vmatpush.msra.mxu3 %v234_v19  ;;  %v223_v32 = vld [vmem:[#allocation5 + $0x100] sm:$0xff]  ;;  %v224_v33 = vld [vmem:[#allocation5 + $0x108] sm:$0xff]  ;;  %v217_v34 = vld [vmem:[#allocation5 + $0xd0] sm:$0xff]  ;;  %p718_p10 = pnand %p717_p2, %p713_p8 }
  0x3b   : > { %300 = vmatpush.msra.mxu1 %v236_v21  ;;  %260 = vmatpush.msra.mxu0 %v231_v24  ;;  %v218_v35 = vld [vmem:[#allocation5 + $0xd8] sm:$0xff]  ;;  %v219_v36 = vld [vmem:[#allocation5 + $0xe0] sm:$0xff]  ;;  %v220_v37 = vld [vmem:[#allocation5 + $0xe8] sm:$0xff] }
  0x3c   : > { %343 = vmatpush.msra.mxu2 %v229_v22  ;;  %384 = vmatpush.msra.mxu3 %v230_v23  ;;  %v213_v38 = vld [vmem:[#allocation5 + $0xb0] sm:$0xff]  ;;  %v214_v39 = vld [vmem:[#allocation5 + $0xb8] sm:$0xff]  ;;  %v215_v40 = vld [vmem:[#allocation5 + $0xc0] sm:$0xff] }
  0x3d   : > { %301 = vmatpush.msra.mxu1 %v232_v25  ;;  %261 = vmatpush.msra.mxu0 %v227_v28  ;;  %v216_v41 = vld [vmem:[#allocation5 + $0xc8] sm:$0xff]  ;;  %v209_v42 = vld [vmem:[#allocation5 + $0x90] sm:$0xff]  ;;  %v210_v43 = vld [vmem:[#allocation5 + $0x98] sm:$0xff] }
  0x3e   : > { %344 = vmatpush.msra.mxu2 %v225_v26  ;;  %385 = vmatpush.msra.mxu3 %v226_v27  ;;  %v211_v44 = vld [vmem:[#allocation5 + $0xa0] sm:$0xff]  ;;  %v212_v45 = vld [vmem:[#allocation5 + $0xa8] sm:$0xff]  ;;  %v205_v46 = vld [vmem:[#allocation5 + $0x70] sm:$0xff] }
  0x3f   : > { %302 = vmatpush.msra.mxu1 %v228_v29  ;;  %262 = vmatpush.msra.mxu0 %v223_v32  ;;  %v206_v47 = vld [vmem:[#allocation5 + $0x78] sm:$0xff]  ;;  %v207_v48 = vld [vmem:[#allocation5 + $0x80] sm:$0xff]  ;;  %v208_v49 = vld [vmem:[#allocation5 + $0x88] sm:$0xff] }
  0x40   : > { %345 = vmatpush.msra.mxu2 %v221_v30  ;;  %386 = vmatpush.msra.mxu3 %v222_v31  ;;  %v201_v50 = vld [vmem:[#allocation5 + $0x50] sm:$0xff]  ;;  %v202_v51 = vld [vmem:[#allocation5 + $0x58] sm:$0xff]  ;;  %v203_v52 = vld [vmem:[#allocation5 + $0x60] sm:$0xff] }
  0x41   : > { %303 = vmatpush.msra.mxu1 %v224_v33  ;;  %263 = vmatpush.msra.mxu0 %v219_v36  ;;  %v204_v53 = vld [vmem:[#allocation5 + $0x68] sm:$0xff]  ;;  %v197_v54 = vld [vmem:[#allocation5 + $0x30] sm:$0xff]  ;;  %v198_v55 = vld [vmem:[#allocation5 + $0x38] sm:$0xff] }
  0x42   : > { %346 = vmatpush.msra.mxu2 %v217_v34  ;;  %387 = vmatpush.msra.mxu3 %v218_v35  ;;  %v199_v56 = vld [vmem:[#allocation5 + $0x40] sm:$0xff]  ;;  %v200_v57 = vld [vmem:[#allocation5 + $0x48] sm:$0xff]  ;;  %v193_v58 = vld [vmem:[#allocation5 + $0x10] sm:$0xff] }
  0x43   : > { %304 = vmatpush.msra.mxu1 %v220_v37  ;;  %264 = vmatpush.msra.mxu0 %v215_v40  ;;  %v194_v59 = vld [vmem:[#allocation5 + $0x18] sm:$0xff]  ;;  %v183_v60 = vld [vmem:[%s887_s14] sm:$0xff]  ;;  %v196_v62 = vld [vmem:[#allocation5 + $0x28] sm:$0xff] }
  0x44   : > { %347 = vmatpush.msra.mxu2 %v213_v38  ;;  %388 = vmatpush.msra.mxu3 %v214_v39  ;;  %v195_v61 = vld [vmem:[#allocation5 + $0x20] sm:$0xff]  ;;  %v192_v0 = vld [vmem:[#allocation5 + $0x8] sm:$0xff]  ;;  %v185_v2 = vld [vmem:[%s887_s14 + $0x10] sm:$0xff] }
  0x45   : > { %305 = vmatpush.msra.mxu1 %v216_v41  ;;  %265 = vmatpush.msra.mxu0 %v211_v44  ;;  %v191_v63 = vld [vmem:[#allocation5] sm:$0xff]  ;;  %v184_v1 = vld [vmem:[%s887_s14 + $0x8] sm:$0xff]  ;;  %v186_v3 = vld [vmem:[%s887_s14 + $0x18] sm:$0xff] }
  0x46   : > { %348 = vmatpush.msra.mxu2 %v209_v42  ;;  %389 = vmatpush.msra.mxu3 %v210_v43  ;;  %v187_v4 = vld [vmem:[%s887_s14 + $0x20] sm:$0xff]  ;;  %v188_v5 = vld [vmem:[%s887_s14 + $0x28] sm:$0xff]  ;;  %v189_v6 = vld [vmem:[%s887_s14 + $0x30] sm:$0xff] }
  0x47   : > { %306 = vmatpush.msra.mxu1 %v212_v45  ;;  %266 = vmatpush.msra.mxu0 %v207_v48  ;;  %v190_v7 = vld [vmem:[%s887_s14 + $0x38] sm:$0xff] }
  0x48   : > { %349 = vmatpush.msra.mxu2 %v205_v46  ;;  %390 = vmatpush.msra.mxu3 %v206_v47 }
  0x49   : > { %307 = vmatpush.msra.mxu1 %v208_v49  ;;  %267 = vmatpush.msra.mxu0 %v203_v52 }
  0x4a   : > { %350 = vmatpush.msra.mxu2 %v201_v50  ;;  %391 = vmatpush.msra.mxu3 %v202_v51 }
  0x4b   : > { %308 = vmatpush.msra.mxu1 %v204_v53  ;;  %268 = vmatpush.msra.mxu0 %v199_v56 }
  0x4c   : > { %351 = vmatpush.msra.mxu2 %v197_v54  ;;  %392 = vmatpush.msra.mxu3 %v198_v55 }
  0x4d   : > { %309 = vmatpush.msra.mxu1 %v200_v57  ;;  %269 = vmatpush.msra.mxu0 %v195_v61 }
  0x4e   : > { %352 = vmatpush.msra.mxu2 %v193_v58  ;;  %393 = vmatpush.msra.mxu3 %v194_v59 }
  0x4f   : > { %353 = vmatmul.f32.vlgmr.msra.gmra.mxu2 %v183_v60  ;;  %394 = vmatmul.f32.vlgmr.msra.gmra.mxu3 %v183_v60 }
  0x50   : > { %310 = vmatpush.msra.mxu1 %v196_v62  ;;  %270 = vmatpush.msra.mxu0 %v191_v63 }
  0x51   : > { %271 = vmatmul.f32.vlgmr.msra.gmra.mxu0 %v183_v60 }
  0x52   : > { %311 = vmatpush.msra.mxu1 %v192_v0 }
  0x53   : > { %312 = vmatmul.f32.vlgmr.msra.gmra.mxu1 %v183_v60 }
  0x57   : > { %356 = vmatmul.f32.gmra.mxu2 %v184_v1  ;;  %397 = vmatmul.f32.gmra.mxu3 %v184_v1 }
  0x59   : > { %274 = vmatmul.f32.gmra.mxu0 %v184_v1 }
  0x5b   : > { %315 = vmatmul.f32.gmra.mxu1 %v184_v1 }
  0x5f   : > { %359 = vmatmul.f32.gmra.mxu2 %v185_v2  ;;  %400 = vmatmul.f32.gmra.mxu3 %v185_v2 }
  0x61   : > { %277 = vmatmul.f32.gmra.mxu0 %v185_v2 }
  0x63   : > { %318 = vmatmul.f32.gmra.mxu1 %v185_v2 }
  0x67   : > { %362 = vmatmul.f32.gmra.mxu2 %v186_v3  ;;  %403 = vmatmul.f32.gmra.mxu3 %v186_v3 }
  0x69   : > { %280 = vmatmul.f32.gmra.mxu0 %v186_v3 }
  0x6b   : > { %321 = vmatmul.f32.gmra.mxu1 %v186_v3 }
  0x6f   : > { %365 = vmatmul.f32.gmra.mxu2 %v187_v4  ;;  %406 = vmatmul.f32.gmra.mxu3 %v187_v4 }
  0x71   : > { %283 = vmatmul.f32.gmra.mxu0 %v187_v4 }
  0x73   : > { %324 = vmatmul.f32.gmra.mxu1 %v187_v4 }
  0x77   : > { %368 = vmatmul.f32.gmra.mxu2 %v188_v5  ;;  %409 = vmatmul.f32.gmra.mxu3 %v188_v5 }
  0x79   : > { %286 = vmatmul.f32.gmra.mxu0 %v188_v5 }
  0x7b   : > { %327 = vmatmul.f32.gmra.mxu1 %v188_v5 }
  0x7f   : > { %371 = vmatmul.f32.gmra.mxu2 %v189_v6  ;;  %412 = vmatmul.f32.gmra.mxu3 %v189_v6 }
  0x81   : > { %289 = vmatmul.f32.gmra.mxu0 %v189_v6 }
  0x83   : > { %330 = vmatmul.f32.gmra.mxu1 %v189_v6 }
  0x87   : > { %374 = vmatmul.f32.gmra.mxu2 %v190_v7  ;;  %415 = vmatmul.f32.gmra.mxu3 %v190_v7 }
  0x89   : > { %292 = vmatmul.f32.gmra.mxu0 %v190_v7 }
  0x8b   : > { %333 = vmatmul.f32.gmra.mxu1 %v190_v7 }
  0xce   : > { %v272_v8 = vpop.f32.mrf.mxu0 }
  0xcf   : > { %419 = vst [vmem:[%s906_s20] sm:$0xff] %v272_v8 }
  0xd0   : > { %v313_v9 = vpop.f32.mrf.mxu1 }
  0xd1   : > { %420 = vst [vmem:[%s906_s20 + $0x8] sm:$0xff] %v313_v9 }
  0xd2   : > { %v354_v10 = vpop.f32.mrf.mxu2  ;;  %v395_v11 = vpop.f32.mrf.mxu3 }
  0xd3   : > { %421 = vst [vmem:[%s906_s20 + $0x10] sm:$0xff] %v354_v10 }
  0xd4   : > { %422 = vst [vmem:[%s906_s20 + $0x18] sm:$0xff] %v395_v11 }
  0xd6   : > { %v275_v12 = vpop.f32.mrf.mxu0 }
  0xd7   : > { %423 = vst [vmem:[%s906_s20 + $0x20] sm:$0xff] %v275_v12 }
  0xd8   : > { %v316_v13 = vpop.f32.mrf.mxu1 }
  0xd9   : > { %424 = vst [vmem:[%s906_s20 + $0x28] sm:$0xff] %v316_v13 }
  0xda   : > { %v357_v14 = vpop.f32.mrf.mxu2  ;;  %v398_v15 = vpop.f32.mrf.mxu3 }
  0xdb   : > { %425 = vst [vmem:[%s906_s20 + $0x30] sm:$0xff] %v357_v14 }
  0xdc   : > { %426 = vst [vmem:[%s906_s20 + $0x38] sm:$0xff] %v398_v15 }
  0xde   : > { %v278_v16 = vpop.f32.mrf.mxu0 }
  0xdf   : > { %427 = vst [vmem:[%s906_s20 + $0x40] sm:$0xff] %v278_v16 }
  0xe0   : > { %v319_v17 = vpop.f32.mrf.mxu1 }
  0xe1   : > { %428 = vst [vmem:[%s906_s20 + $0x48] sm:$0xff] %v319_v17 }
  0xe2   : > { %v360_v18 = vpop.f32.mrf.mxu2  ;;  %v401_v19 = vpop.f32.mrf.mxu3 }
  0xe3   : > { %429 = vst [vmem:[%s906_s20 + $0x50] sm:$0xff] %v360_v18 }
  0xe4   : > { %430 = vst [vmem:[%s906_s20 + $0x58] sm:$0xff] %v401_v19 }
  0xe6   : > { %v281_v20 = vpop.f32.mrf.mxu0 }
  0xe7   : > { %431 = vst [vmem:[%s906_s20 + $0x60] sm:$0xff] %v281_v20 }
  0xe8   : > { %v322_v21 = vpop.f32.mrf.mxu1 }
  0xe9   : > { %432 = vst [vmem:[%s906_s20 + $0x68] sm:$0xff] %v322_v21 }
  0xea   : > { %v363_v22 = vpop.f32.mrf.mxu2  ;;  %v404_v23 = vpop.f32.mrf.mxu3 }
  0xeb   : > { %433 = vst [vmem:[%s906_s20 + $0x70] sm:$0xff] %v363_v22 }
  0xec   : > { %434 = vst [vmem:[%s906_s20 + $0x78] sm:$0xff] %v404_v23 }
  0xee   : > { %v284_v24 = vpop.f32.mrf.mxu0 }
  0xef   : > { %435 = vst [vmem:[%s906_s20 + $0x80] sm:$0xff] %v284_v24 }
  0xf0   : > { %v325_v25 = vpop.f32.mrf.mxu1 }
  0xf1   : > { %436 = vst [vmem:[%s906_s20 + $0x88] sm:$0xff] %v325_v25 }
  0xf2   : > { %v366_v26 = vpop.f32.mrf.mxu2  ;;  %v407_v27 = vpop.f32.mrf.mxu3 }
  0xf3   : > { %437 = vst [vmem:[%s906_s20 + $0x90] sm:$0xff] %v366_v26 }
  0xf4   : > { %438 = vst [vmem:[%s906_s20 + $0x98] sm:$0xff] %v407_v27 }
  0xf6   : > { %v287_v28 = vpop.f32.mrf.mxu0 }
  0xf7   : > { %439 = vst [vmem:[%s906_s20 + $0xa0] sm:$0xff] %v287_v28 }
  0xf8   : > { %v328_v29 = vpop.f32.mrf.mxu1 }
  0xf9   : > { %440 = vst [vmem:[%s906_s20 + $0xa8] sm:$0xff] %v328_v29 }
  0xfa   : > { %v369_v30 = vpop.f32.mrf.mxu2  ;;  %v410_v31 = vpop.f32.mrf.mxu3 }
  0xfb   : > { %441 = vst [vmem:[%s906_s20 + $0xb0] sm:$0xff] %v369_v30 }
  0xfc   : > { %442 = vst [vmem:[%s906_s20 + $0xb8] sm:$0xff] %v410_v31 }
  0xfe   : > { %v290_v32 = vpop.f32.mrf.mxu0 }
  0xff   : > { %443 = vst [vmem:[%s906_s20 + $0xc0] sm:$0xff] %v290_v32 }
 0x100   : > { %v331_v33 = vpop.f32.mrf.mxu1 }
 0x101   : > { %444 = vst [vmem:[%s906_s20 + $0xc8] sm:$0xff] %v331_v33 }
 0x102   : > { %v372_v34 = vpop.f32.mrf.mxu2  ;;  %v413_v35 = vpop.f32.mrf.mxu3 }
 0x103   : > { %445 = vst [vmem:[%s906_s20 + $0xd0] sm:$0xff] %v372_v34 }
 0x104   : > { %446 = vst [vmem:[%s906_s20 + $0xd8] sm:$0xff] %v413_v35 }
 0x106   : > { %v293_v36 = vpop.f32.mrf.mxu0 }
 0x107   : > { %447 = vst [vmem:[%s906_s20 + $0xe0] sm:$0xff] %v293_v36 }
 0x108   : > { %v334_v37 = vpop.f32.mrf.mxu1 }
 0x109   : > { %448 = vst [vmem:[%s906_s20 + $0xe8] sm:$0xff] %v334_v37 }
 0x10a   : > { %v375_v38 = vpop.f32.mrf.mxu2  ;;  %v416_v39 = vpop.f32.mrf.mxu3 }
 0x10b   : > { %449 = vst [vmem:[%s906_s20 + $0xf0] sm:$0xff] %v375_v38 }
 0x10c   : > { %450 = vst [vmem:[%s906_s20 + $0xf8] sm:$0xff] %v416_v39 }
 0x10d   : > { %721 = shalt.err (!%p718_p10)
}
 0x10e   : > { %s771_s5 = smov 512   ;;  %s772_s6 = smov 32  }
 0x10f   : > { %577 = dma.vmem_to_hbm [thread:$0]  (%p855_p7), %s466_s21, 4096, %s468_s22, %s452_s13, %s771_s5, %s771_s5, %s772_s6  }
 0x110 PF: > { %s482_s7 = sand.u32 1, %s752_s9   ;;  %p982_p12 = scmp.ge.s32.totalorder %s764_s12, 2 }
 0x111   : > { %s483_s14 = scalar_lea.sflag [#allocation4], %s482_s7 }
 0x112   : > { %p588_p13 = pnand %p982_p12, %p823_p6 }
 0x114   : > { %p589_p0 = pneg %p588_p13 }
 0x116   : > { %747 = dma.done.wait (%p589_p0), %s483_s14, 4096  }
 0x117   : > { %749 = vsyncadd (%p589_p0), %s483_s14, 4294963200  ;;  %p16_p3 = scmp.ge.s32.totalorder %s841_s23, 4   ;;  %s983_s9 = smov %s756_s10 }
 0x118   : > { %s984_s10 = smov %s760_s11  ;;  %s985_s11 = smov %s851_s28 }
 0x119   : > { %s986_s12 = smov %s841_s23  ;;  %18 = sbr.rel (!%p16_p3) target bundleno = 6 (0x6), region = 77 }
 0x11e   :  { %489 = vsyncpa [#allocation3], 1 }
 0x11f   :  { %491 = vsyncpa [#allocation3 + $0x1], 1 }
 0x120   :  { %492 = vsyncpa [#allocation6], 1 }
 0x121   :  { %493 = vsyncpa [#allocation4], 1 }
 0x122   :  { %495 = vsyncpa [#allocation4 + $0x1], 1 }

</bundles_post_ra>
